<compile_context>
chip_gen: v6e
topology: v6e:2x2x1
jax: 0.10.0
libtpu: 0.0.40
codegen_flags: <defaults>
</compile_context>

<pallas_src>
import jax
import jax.numpy as jnp
from jax.experimental import pallas as pl
from jax.experimental.pallas import tpu as pltpu


# ------------------------- model hyper-params (small) ------------------------
OBSERVATION_SPACE = (4, 4)        # input_size = 16
AGENT_SPACE = (4,)                # agent_input_size = 4
MEM_SIZE = 8
ROTATIONS = 4
PHEROMONES = 3
POWER = 5

INPUT_SIZE = 1
for d in OBSERVATION_SPACE:
    INPUT_SIZE *= d
AGENT_INPUT_SIZE = 1
for d in AGENT_SPACE:
    AGENT_INPUT_SIZE *= d
AGENT_TOTAL = AGENT_INPUT_SIZE + MEM_SIZE            # 12
IN_DIM = INPUT_SIZE + AGENT_TOTAL                    # 28
IN_PAD = 32                                          # zero-padded K width
OLD_MEM_START = INPUT_SIZE + AGENT_INPUT_SIZE        # 20 (old memory lanes 20:28)

H1 = 2 ** (2 + POWER)   # 128
H2 = 2 ** (3 + POWER)   # 256
H3 = 2 ** (1 + POWER)   # 64

TAIL_IN = H2 + H3 + H1                               # 448 = [r2 | p1 | m2]
TAIL_OUT = 24                                        # [rot4 | pher3 | pad1 | mem8 | forget8]
OUT_PAD = 16                                         # packed output: [rot4 | pher3 | pad1 | mem8]


def _round_up(x, m):
    return ((x + m - 1) // m) * m


def _linear_bf16(x_f32, w_ref, b_ref):
    """bf16-operand matmul with f32 accumulation; bias add in f32."""
    return jnp.dot(x_f32.astype(jnp.bfloat16), w_ref[...],
                   preferred_element_type=jnp.float32) + b_ref[...]


# --------------------------------- kernel ------------------------------------
def collect_model_kernel(
    x_ref,
    w1, b1, w2, b2, w3, b3, w4, b4,   # trunk (w4/b4 N-padded to 32)
    hw1, hb1,                          # fused [rotation1 | memory1 | pheromone1]  (32, 320)
    rw2, rb2,                          # rotation2                                  (128, 256)
    mw2, mb2,                          # memory2                                    (128, 128)
    tw, tb_,                           # fused block-diag tail                      (448, 24)
    out_ref,
):
    x = x_ref[...]                                     # (TB, 32) f32, lanes 28:32 zero
    old_mem = x[:, OLD_MEM_START:OLD_MEM_START + MEM_SIZE]   # (TB, 8)

    # general trunk: relu on layers 1-3, no activation on layer4
    g = jnp.maximum(_linear_bf16(x, w1, b1), 0.0)
    g = jnp.maximum(_linear_bf16(g, w2, b2), 0.0)
    g = jnp.maximum(_linear_bf16(g, w3, b3), 0.0)
    g = _linear_bf16(g, w4, b4)                        # (TB, 32), lanes 28:32 stay zero

    h = g + x                                          # residual combine (f32)

    # fused first layer of all three heads (shared input h)
    h1 = _linear_bf16(h, hw1, hb1)                     # (TB, 320)
    r1 = h1[:, :H1]                                    # rotation branch  (TB, 128)
    m1 = h1[:, H1:2 * H1]                              # memory branch    (TB, 128)
    p1 = h1[:, 2 * H1:2 * H1 + H3]                     # pheromone branch (TB, 64)

    r2 = _linear_bf16(r1, rw2, rb2)                    # (TB, 256)
    m2 = _linear_bf16(m1, mw2, mb2)                    # (TB, 128)

    # fused block-diagonal tail: [rot | pher | pad | mem_pre | forget_pre]
    tail_in = jnp.concatenate([r2, p1, m2], axis=1)    # (TB, 448)
    t = _linear_bf16(tail_in, tw, tb_)                 # (TB, 24)

    new_mem = jnp.tanh(t[:, 8:8 + MEM_SIZE])
    forget = jax.nn.sigmoid(t[:, 8 + MEM_SIZE:])
    mem = old_mem + forget * (new_mem - old_mem)       # gated update (f32)

    # packed output slab: [rot(4) | pher(3) | pad(1) | mem(8)]
    out_ref[...] = jnp.concatenate([t[:, :8], mem], axis=1)


# ------------------------------ parameters -----------------------------------
def init_linear(key, fan_in, fan_out):
    """PyTorch-style uniform(-1/sqrt(fan_in), 1/sqrt(fan_in)) init.
    Weight stored as (fan_in, fan_out), i.e. already transposed for x @ W."""
    kw, kb = jax.random.split(key)
    bound = 1.0 / float(fan_in) ** 0.5
    w = jax.random.uniform(kw, (fan_in, fan_out), jnp.float32, -bound, bound)
    b = jax.random.uniform(kb, (1, fan_out), jnp.float32, -bound, bound)
    return w, b


def make_params(seed=0):
    key = jax.random.PRNGKey(seed)
    keys = jax.random.split(key, 13)
    layer_dims = [
        (IN_DIM, H1), (H1, H2), (H2, H3), (H3, IN_DIM),          # layer1..4
        (IN_DIM, H1), (H1, H2), (H2, ROTATIONS),                  # rotation 1..3
        (IN_DIM, H3), (H3, PHEROMONES),                           # pheromone 1..2
        (IN_DIM, H1), (H1, H1), (H1, MEM_SIZE),                   # memory 1..3
        (H1, MEM_SIZE),                                           # forget
    ]
    params = []
    for k, (fi, fo) in zip(keys, layer_dims):
        w, b = init_linear(k, fi, fo)
        params.append(w)
        params.append(b)
    return params


def prepare_params(params):
    """Fuse / pad / narrow the raw parameter list for the kernel.

    Returns interleaved (w, b) pairs in kernel-argument order; weights in bf16,
    biases in f32.
    """
    (w1, b1, w2, b2, w3, b3, w4, b4,
     rw1, rb1, rw2, rb2, rw3, rb3,
     pw1, pb1, pw2, pb2,
     mw1, mb1, mw2, mb2, mw3, mb3,
     fw, fb) = params

    def kpad(w, k_to):       # zero-pad fan-in (rows)
        return jnp.pad(w, ((0, k_to - w.shape[0]), (0, 0)))

    def npad(a, n_to):       # zero-pad fan-out (cols)
        return jnp.pad(a, ((0, 0), (0, n_to - a.shape[1])))

    # trunk: K-pad layer1, N-pad layer4 to the 32-wide input slab
    w1p = kpad(w1, IN_PAD)                                   # (32, 128)
    w4p = npad(w4, IN_PAD)                                   # (64, 32)
    b4p = npad(b4, IN_PAD)                                   # (1, 32)

    # fused head entry [rotation1 | memory1 | pheromone1], K-padded to 32
    hw1 = kpad(jnp.concatenate([rw1, mw1, pw1], axis=1), IN_PAD)   # (32, 320)
    hb1 = jnp.concatenate([rb1, mb1, pb1], axis=1)                  # (1, 320)

    # fused block-diagonal tail over [r2(256) | p1(64) | m2(128)]
    #   -> [rot(4) | pher(3) | pad(1) | mem_pre(8) | forget_pre(8)]
    tw = jnp.zeros((TAIL_IN, TAIL_OUT), jnp.float32)
    tw = tw.at[:H2, 0:ROTATIONS].set(rw3)
    tw = tw.at[H2:H2 + H3, ROTATIONS:ROTATIONS + PHEROMONES].set(pw2)
    tw = tw.at[H2 + H3:, 8:8 + MEM_SIZE].set(mw3)
    tw = tw.at[H2 + H3:, 8 + MEM_SIZE:].set(fw)
    tb_ = jnp.zeros((1, TAIL_OUT), jnp.float32)
    tb_ = tb_.at[:, 0:ROTATIONS].set(rb3)
    tb_ = tb_.at[:, ROTATIONS:ROTATIONS + PHEROMONES].set(pb2)
    tb_ = tb_.at[:, 8:8 + MEM_SIZE].set(mb3)
    tb_ = tb_.at[:, 8 + MEM_SIZE:].set(fb)

    weights = [w1p, w2, w3, w4p, hw1, rw2, mw2, tw]
    biases = [b1, b2, b3, b4p, hb1, rb2, mb2, tb_]

    fused = []
    for w, b in zip(weights, biases):
        fused.append(w.astype(jnp.bfloat16))   # MXU operands in bf16
        fused.append(b.astype(jnp.float32))    # bias add stays f32
    return tuple(fused)


# -------------------------------- wrapper ------------------------------------
def collect_model_forward(state, agent_state, params, *, batch_tile=2048):
    """state: (B, *observation_space); agent_state: (B, agent_input_size + mem_size)."""
    B = state.shape[0]
    state_flat = state.reshape(B, INPUT_SIZE).astype(jnp.float32)
    agent_flat = agent_state.reshape(B, AGENT_TOTAL).astype(jnp.float32)
    # single (B, 32) input slab: [state(16) | agent(4) | old_mem(8) | zero(4)]
    x = jnp.concatenate([state_flat, agent_flat], axis=1)
    x = jnp.pad(x, ((0, 0), (0, IN_PAD - IN_DIM)))

    fused = prepare_params(params)

    # adaptive tile selection: minimize padding; >=2 grid steps so the
    # "parallel" batch axis splits across v7x's two TensorCores.
    min_tiles = 2 if B >= 16 else 1
    n_tiles = max(pl.cdiv(B, batch_tile), min_tiles)
    tb = _round_up(pl.cdiv(B, n_tiles), 8)
    b_pad = n_tiles * tb
    if b_pad != B:
        x = jnp.pad(x, ((0, b_pad - B), (0, 0)))

    grid = (n_tiles,)

    x_spec = pl.BlockSpec((tb, IN_PAD), lambda i: (i, 0))
    # constant index map -> weights DMA'd once, stay VMEM-resident across grid
    weight_specs = [pl.BlockSpec(p.shape, lambda i: (0, 0)) for p in fused]
    out_spec = pl.BlockSpec((tb, OUT_PAD), lambda i: (i, 0))

    matmul_elems = sum(int(w.shape[0]) * int(w.shape[1]) for w in fused[0::2])
    param_bytes = sum(int(p.size) * p.dtype.itemsize for p in fused)
    cost = pl.CostEstimate(
        flops=2 * b_pad * matmul_elems,
        transcendentals=2 * MEM_SIZE * b_pad,
        bytes_accessed=param_bytes + b_pad * (IN_PAD + OUT_PAD) * 4,
    )

    fn = pl.pallas_call(
        collect_model_kernel,
        out_shape=jax.ShapeDtypeStruct((b_pad, OUT_PAD), jnp.float32),
        grid_spec=pltpu.PrefetchScalarGridSpec(
            num_scalar_prefetch=0,
            grid=grid,
            in_specs=[x_spec] + weight_specs,
            out_specs=out_spec,
        ),
        compiler_params=pltpu.CompilerParams(
            dimension_semantics=("parallel",),
            vmem_limit_bytes=48 * 1024 * 1024,   # safe on v7x (64 MiB), ample on v5e/v6e
        ),
        cost_estimate=cost,
    )
    out = fn(x, *fused)

    rotation = out[:B, 0:ROTATIONS]
    pheromone = out[:B, ROTATIONS:ROTATIONS + PHEROMONES]
    new_memory = out[:B, 8:8 + MEM_SIZE]
    return rotation, pheromone, new_memory


# --------------------------- pure-JAX reference -------------------------------
def collect_model_reference(state, agent_state, params):
    """All-f32 reference; defines the PyTorch forward semantics."""
    B = state.shape[0]
    state_flat = state.reshape(B, INPUT_SIZE).astype(jnp.float32)
    agent_flat = agent_state.reshape(B, AGENT_TOTAL).astype(jnp.float32)
    old_memory = agent_flat[:, AGENT_INPUT_SIZE:]
    x = jnp.concatenate([state_flat, agent_flat], axis=1)
    (w1, b1, w2, b2, w3, b3, w4, b4,
     rw1, rb1, rw2, rb2, rw3, rb3,
     pw1, pb1, pw2, pb2,
     mw1, mb1, mw2, mb2, mw3, mb3,
     fw, fb) = params
    lin = lambda a, w, b: a @ w + b
    g = jax.nn.relu(lin(x, w1, b1))
    g = jax.nn.relu(lin(g, w2, b2))
    g = jax.nn.relu(lin(g, w3, b3))
    g = lin(g, w4, b4)
    h = g + x
    rot = lin(lin(lin(h, rw1, rb1), rw2, rb2), rw3, rb3)
    pher = lin(lin(h, pw1, pb1), pw2, pb2)
    m = lin(lin(h, mw1, mb1), mw2, mb2)
    new_mem = jnp.tanh(lin(m, mw3, mb3))
    forget = jax.nn.sigmoid(lin(m, fw, fb))
    mem = new_mem * forget + old_memory * (1.0 - forget)
    return rot, pher, mem


if __name__ == "__main__":
    B = 2
    key = jax.random.PRNGKey(0)
    k1, k2 = jax.random.split(key)
    state = jax.random.normal(k1, (B,) + OBSERVATION_SPACE, jnp.float32)
    agent_state = jax.random.normal(k2, (B, AGENT_TOTAL), jnp.float32)

    params = make_params(seed=0)

    rotation, pheromone, new_memory = collect_model_forward(state, agent_state, params)
    jax.block_until_ready((rotation, pheromone, new_memory))

    assert rotation.shape == (B, ROTATIONS)
    assert pheromone.shape == (B, PHEROMONES)
    assert new_memory.shape == (B, MEM_SIZE)

    # Check vs. the f32 reference.  Tolerance is the explicit accuracy budget of
    # the intentional bf16-operand / f32-accumulate matmul path (an all-f32
    # kernel matches at ~1e-5).
    r_ref, p_ref, m_ref = collect_model_reference(state, agent_state, params)
    assert bool(jnp.allclose(rotation, r_ref, rtol=5e-2, atol=5e-2))
    assert bool(jnp.allclose(pheromone, p_ref, rtol=5e-2, atol=5e-2))
    assert bool(jnp.allclose(new_memory, m_ref, rtol=5e-2, atol=5e-2))

    print("KERNEL_OK")
</pallas_src>

<mosaic_0001>
module attributes {stable_mosaic.version = 11 : i64} {
  func.func @collect_model_kernel(%arg0: i32, %arg1: memref<8x32xf32, #tpu.memory_space<vmem>>, %arg2: memref<32x128xbf16, #tpu.memory_space<vmem>>, %arg3: memref<1x128xf32, #tpu.memory_space<vmem>>, %arg4: memref<128x256xbf16, #tpu.memory_space<vmem>>, %arg5: memref<1x256xf32, #tpu.memory_space<vmem>>, %arg6: memref<256x64xbf16, #tpu.memory_space<vmem>>, %arg7: memref<1x64xf32, #tpu.memory_space<vmem>>, %arg8: memref<64x32xbf16, #tpu.memory_space<vmem>>, %arg9: memref<1x32xf32, #tpu.memory_space<vmem>>, %arg10: memref<32x320xbf16, #tpu.memory_space<vmem>>, %arg11: memref<1x320xf32, #tpu.memory_space<vmem>>, %arg12: memref<128x256xbf16, #tpu.memory_space<vmem>>, %arg13: memref<1x256xf32, #tpu.memory_space<vmem>>, %arg14: memref<128x128xbf16, #tpu.memory_space<vmem>>, %arg15: memref<1x128xf32, #tpu.memory_space<vmem>>, %arg16: memref<448x24xbf16, #tpu.memory_space<vmem>>, %arg17: memref<1x24xf32, #tpu.memory_space<vmem>>, %arg18: memref<8x16xf32, #tpu.memory_space<vmem>>) attributes {dimension_semantics = [#tpu.dimension_semantics<parallel>], iteration_bounds = array<i64: 1>, scalar_prefetch = 0 : i64, scratch_operands = 0 : i64, tpu.core_type = #tpu.core_type<tc>, window_params = [{transform_indices = @transform_0, window_bounds = array<i64: 8, 32>}, {pipeline_mode = #tpu.pipeline_mode<synchronous>, transform_indices = @transform_1, window_bounds = array<i64: 32, 128>}, {pipeline_mode = #tpu.pipeline_mode<synchronous>, transform_indices = @transform_2, window_bounds = array<i64: 1, 128>}, {pipeline_mode = #tpu.pipeline_mode<synchronous>, transform_indices = @transform_3, window_bounds = array<i64: 128, 256>}, {pipeline_mode = #tpu.pipeline_mode<synchronous>, transform_indices = @transform_4, window_bounds = array<i64: 1, 256>}, {pipeline_mode = #tpu.pipeline_mode<synchronous>, transform_indices = @transform_5, window_bounds = array<i64: 256, 64>}, {pipeline_mode = #tpu.pipeline_mode<synchronous>, transform_indices = @transform_6, window_bounds = array<i64: 1, 64>}, {pipeline_mode = #tpu.pipeline_mode<synchronous>, transform_indices = @transform_7, window_bounds = array<i64: 64, 32>}, {pipeline_mode = #tpu.pipeline_mode<synchronous>, transform_indices = @transform_8, window_bounds = array<i64: 1, 32>}, {pipeline_mode = #tpu.pipeline_mode<synchronous>, transform_indices = @transform_9, window_bounds = array<i64: 32, 320>}, {pipeline_mode = #tpu.pipeline_mode<synchronous>, transform_indices = @transform_10, window_bounds = array<i64: 1, 320>}, {pipeline_mode = #tpu.pipeline_mode<synchronous>, transform_indices = @transform_11, window_bounds = array<i64: 128, 256>}, {pipeline_mode = #tpu.pipeline_mode<synchronous>, transform_indices = @transform_12, window_bounds = array<i64: 1, 256>}, {pipeline_mode = #tpu.pipeline_mode<synchronous>, transform_indices = @transform_13, window_bounds = array<i64: 128, 128>}, {pipeline_mode = #tpu.pipeline_mode<synchronous>, transform_indices = @transform_14, window_bounds = array<i64: 1, 128>}, {pipeline_mode = #tpu.pipeline_mode<synchronous>, transform_indices = @transform_15, window_bounds = array<i64: 448, 24>}, {pipeline_mode = #tpu.pipeline_mode<synchronous>, transform_indices = @transform_16, window_bounds = array<i64: 1, 24>}, {transform_indices = @transform_17, window_bounds = array<i64: 8, 16>}]} {
    %c0 = arith.constant 0 : index
    %c0_0 = arith.constant 0 : index
    %0 = vector.load %arg1[%c0, %c0_0] : memref<8x32xf32, #tpu.memory_space<vmem>>, vector<8x32xf32>
    %1 = vector.extract_strided_slice %0 {offsets = [0, 20], sizes = [8, 8], strides = [1, 1]} : vector<8x32xf32> to vector<8x8xf32>
    %2 = arith.truncf %0 : vector<8x32xf32> to vector<8x32xbf16>
    %c0_1 = arith.constant 0 : index
    %c0_2 = arith.constant 0 : index
    %3 = vector.load %arg2[%c0_1, %c0_2] : memref<32x128xbf16, #tpu.memory_space<vmem>>, vector<32x128xbf16>
    %cst = arith.constant dense<0.000000e+00> : vector<8x128xf32>
    %4 = tpu.matmul %2, %3, %cst {dimension_numbers = #tpu.dot_dimension_numbers<[1], [0], [0], [1], [0, 0, 1, 1], [], []>} : vector<8x32xbf16>, vector<32x128xbf16>, vector<8x128xf32> -> vector<8x128xf32>
    %c0_3 = arith.constant 0 : index
    %c0_4 = arith.constant 0 : index
    %5 = vector.load %arg3[%c0_3, %c0_4] : memref<1x128xf32, #tpu.memory_space<vmem>>, vector<1x128xf32>
    %6 = vector.broadcast %5 : vector<1x128xf32> to vector<8x128xf32>
    %7 = arith.addf %4, %6 : vector<8x128xf32>
    %cst_5 = arith.constant 0.000000e+00 : f32
    %8 = vector.broadcast %cst_5 : f32 to vector<8x128xf32>
    %9 = arith.maximumf %7, %8 : vector<8x128xf32>
    %10 = arith.truncf %9 : vector<8x128xf32> to vector<8x128xbf16>
    %c0_6 = arith.constant 0 : index
    %c0_7 = arith.constant 0 : index
    %11 = vector.load %arg4[%c0_6, %c0_7] : memref<128x256xbf16, #tpu.memory_space<vmem>>, vector<128x256xbf16>
    %cst_8 = arith.constant dense<0.000000e+00> : vector<8x256xf32>
    %12 = tpu.matmul %10, %11, %cst_8 {dimension_numbers = #tpu.dot_dimension_numbers<[1], [0], [0], [1], [0, 0, 1, 1], [], []>} : vector<8x128xbf16>, vector<128x256xbf16>, vector<8x256xf32> -> vector<8x256xf32>
    %c0_9 = arith.constant 0 : index
    %c0_10 = arith.constant 0 : index
    %13 = vector.load %arg5[%c0_9, %c0_10] : memref<1x256xf32, #tpu.memory_space<vmem>>, vector<1x256xf32>
    %14 = vector.broadcast %13 : vector<1x256xf32> to vector<8x256xf32>
    %15 = arith.addf %12, %14 : vector<8x256xf32>
    %cst_11 = arith.constant 0.000000e+00 : f32
    %16 = vector.broadcast %cst_11 : f32 to vector<8x256xf32>
    %17 = arith.maximumf %15, %16 : vector<8x256xf32>
    %18 = arith.truncf %17 : vector<8x256xf32> to vector<8x256xbf16>
    %c0_12 = arith.constant 0 : index
    %c0_13 = arith.constant 0 : index
    %19 = vector.load %arg6[%c0_12, %c0_13] : memref<256x64xbf16, #tpu.memory_space<vmem>>, vector<256x64xbf16>
    %cst_14 = arith.constant dense<0.000000e+00> : vector<8x64xf32>
    %20 = tpu.matmul %18, %19, %cst_14 {dimension_numbers = #tpu.dot_dimension_numbers<[1], [0], [0], [1], [0, 0, 1, 1], [], []>} : vector<8x256xbf16>, vector<256x64xbf16>, vector<8x64xf32> -> vector<8x64xf32>
    %c0_15 = arith.constant 0 : index
    %c0_16 = arith.constant 0 : index
    %21 = vector.load %arg7[%c0_15, %c0_16] : memref<1x64xf32, #tpu.memory_space<vmem>>, vector<1x64xf32>
    %22 = vector.broadcast %21 : vector<1x64xf32> to vector<8x64xf32>
    %23 = arith.addf %20, %22 : vector<8x64xf32>
    %cst_17 = arith.constant 0.000000e+00 : f32
    %24 = vector.broadcast %cst_17 : f32 to vector<8x64xf32>
    %25 = arith.maximumf %23, %24 : vector<8x64xf32>
    %26 = arith.truncf %25 : vector<8x64xf32> to vector<8x64xbf16>
    %c0_18 = arith.constant 0 : index
    %c0_19 = arith.constant 0 : index
    %27 = vector.load %arg8[%c0_18, %c0_19] : memref<64x32xbf16, #tpu.memory_space<vmem>>, vector<64x32xbf16>
    %cst_20 = arith.constant dense<0.000000e+00> : vector<8x32xf32>
    %28 = tpu.matmul %26, %27, %cst_20 {dimension_numbers = #tpu.dot_dimension_numbers<[1], [0], [0], [1], [0, 0, 1, 1], [], []>} : vector<8x64xbf16>, vector<64x32xbf16>, vector<8x32xf32> -> vector<8x32xf32>
    %c0_21 = arith.constant 0 : index
    %c0_22 = arith.constant 0 : index
    %29 = vector.load %arg9[%c0_21, %c0_22] : memref<1x32xf32, #tpu.memory_space<vmem>>, vector<1x32xf32>
    %30 = vector.broadcast %29 : vector<1x32xf32> to vector<8x32xf32>
    %31 = arith.addf %28, %30 : vector<8x32xf32>
    %32 = arith.addf %31, %0 : vector<8x32xf32>
    %33 = arith.truncf %32 : vector<8x32xf32> to vector<8x32xbf16>
    %c0_23 = arith.constant 0 : index
    %c0_24 = arith.constant 0 : index
    %34 = vector.load %arg10[%c0_23, %c0_24] : memref<32x320xbf16, #tpu.memory_space<vmem>>, vector<32x320xbf16>
    %cst_25 = arith.constant dense<0.000000e+00> : vector<8x320xf32>
    %35 = tpu.matmul %33, %34, %cst_25 {dimension_numbers = #tpu.dot_dimension_numbers<[1], [0], [0], [1], [0, 0, 1, 1], [], []>} : vector<8x32xbf16>, vector<32x320xbf16>, vector<8x320xf32> -> vector<8x320xf32>
    %c0_26 = arith.constant 0 : index
    %c0_27 = arith.constant 0 : index
    %36 = vector.load %arg11[%c0_26, %c0_27] : memref<1x320xf32, #tpu.memory_space<vmem>>, vector<1x320xf32>
    %37 = vector.broadcast %36 : vector<1x320xf32> to vector<8x320xf32>
    %38 = arith.addf %35, %37 : vector<8x320xf32>
    %39 = vector.extract_strided_slice %38 {offsets = [0, 0], sizes = [8, 128], strides = [1, 1]} : vector<8x320xf32> to vector<8x128xf32>
    %40 = vector.extract_strided_slice %38 {offsets = [0, 128], sizes = [8, 128], strides = [1, 1]} : vector<8x320xf32> to vector<8x128xf32>
    %41 = vector.extract_strided_slice %38 {offsets = [0, 256], sizes = [8, 64], strides = [1, 1]} : vector<8x320xf32> to vector<8x64xf32>
    %42 = arith.truncf %39 : vector<8x128xf32> to vector<8x128xbf16>
    %c0_28 = arith.constant 0 : index
    %c0_29 = arith.constant 0 : index
    %43 = vector.load %arg12[%c0_28, %c0_29] : memref<128x256xbf16, #tpu.memory_space<vmem>>, vector<128x256xbf16>
    %cst_30 = arith.constant dense<0.000000e+00> : vector<8x256xf32>
    %44 = tpu.matmul %42, %43, %cst_30 {dimension_numbers = #tpu.dot_dimension_numbers<[1], [0], [0], [1], [0, 0, 1, 1], [], []>} : vector<8x128xbf16>, vector<128x256xbf16>, vector<8x256xf32> -> vector<8x256xf32>
    %c0_31 = arith.constant 0 : index
    %c0_32 = arith.constant 0 : index
    %45 = vector.load %arg13[%c0_31, %c0_32] : memref<1x256xf32, #tpu.memory_space<vmem>>, vector<1x256xf32>
    %46 = vector.broadcast %45 : vector<1x256xf32> to vector<8x256xf32>
    %47 = arith.addf %44, %46 : vector<8x256xf32>
    %48 = arith.truncf %40 : vector<8x128xf32> to vector<8x128xbf16>
    %c0_33 = arith.constant 0 : index
    %c0_34 = arith.constant 0 : index
    %49 = vector.load %arg14[%c0_33, %c0_34] : memref<128x128xbf16, #tpu.memory_space<vmem>>, vector<128x128xbf16>
    %cst_35 = arith.constant dense<0.000000e+00> : vector<8x128xf32>
    %50 = tpu.matmul %48, %49, %cst_35 {dimension_numbers = #tpu.dot_dimension_numbers<[1], [0], [0], [1], [0, 0, 1, 1], [], []>} : vector<8x128xbf16>, vector<128x128xbf16>, vector<8x128xf32> -> vector<8x128xf32>
    %c0_36 = arith.constant 0 : index
    %c0_37 = arith.constant 0 : index
    %51 = vector.load %arg15[%c0_36, %c0_37] : memref<1x128xf32, #tpu.memory_space<vmem>>, vector<1x128xf32>
    %52 = vector.broadcast %51 : vector<1x128xf32> to vector<8x128xf32>
    %53 = arith.addf %50, %52 : vector<8x128xf32>
    %54 = tpu.concatenate %47, %41, %53 in 1 : vector<8x256xf32>, vector<8x64xf32>, vector<8x128xf32> -> vector<8x448xf32>
    %55 = arith.truncf %54 : vector<8x448xf32> to vector<8x448xbf16>
    %c0_38 = arith.constant 0 : index
    %c0_39 = arith.constant 0 : index
    %56 = vector.load %arg16[%c0_38, %c0_39] : memref<448x24xbf16, #tpu.memory_space<vmem>>, vector<448x24xbf16>
    %cst_40 = arith.constant dense<0.000000e+00> : vector<8x24xf32>
    %57 = tpu.matmul %55, %56, %cst_40 {dimension_numbers = #tpu.dot_dimension_numbers<[1], [0], [0], [1], [0, 0, 1, 1], [], []>} : vector<8x448xbf16>, vector<448x24xbf16>, vector<8x24xf32> -> vector<8x24xf32>
    %c0_41 = arith.constant 0 : index
    %c0_42 = arith.constant 0 : index
    %58 = vector.load %arg17[%c0_41, %c0_42] : memref<1x24xf32, #tpu.memory_space<vmem>>, vector<1x24xf32>
    %59 = vector.broadcast %58 : vector<1x24xf32> to vector<8x24xf32>
    %60 = arith.addf %57, %59 : vector<8x24xf32>
    %61 = vector.extract_strided_slice %60 {offsets = [0, 8], sizes = [8, 8], strides = [1, 1]} : vector<8x24xf32> to vector<8x8xf32>
    %62 = math.tanh %61 : vector<8x8xf32>
    %63 = vector.extract_strided_slice %60 {offsets = [0, 16], sizes = [8, 8], strides = [1, 1]} : vector<8x24xf32> to vector<8x8xf32>
    %64 = arith.negf %63 : vector<8x8xf32>
    %65 = math.exp %64 : vector<8x8xf32>
    %cst_43 = arith.constant 1.000000e+00 : f32
    %66 = vector.broadcast %cst_43 : f32 to vector<8x8xf32>
    %67 = arith.addf %66, %65 : vector<8x8xf32>
    %68 = arith.divf %66, %67 : vector<8x8xf32>
    %69 = arith.subf %62, %1 : vector<8x8xf32>
    %70 = arith.mulf %68, %69 : vector<8x8xf32>
    %71 = arith.addf %1, %70 : vector<8x8xf32>
    %72 = vector.extract_strided_slice %60 {offsets = [0, 0], sizes = [8, 8], strides = [1, 1]} : vector<8x24xf32> to vector<8x8xf32>
    %73 = tpu.concatenate %72, %71 in 1 : vector<8x8xf32>, vector<8x8xf32> -> vector<8x16xf32>
    %c0_44 = arith.constant 0 : index
    %c0_45 = arith.constant 0 : index
    %74 = vector.load %arg18[%c0_44, %c0_45] : memref<8x16xf32, #tpu.memory_space<vmem>>, vector<8x16xf32>
    tpu.vector_store %arg18[%c0_44, %c0_45], %73 {strides = array<i32>} : memref<8x16xf32, #tpu.memory_space<vmem>>, vector<8x16xf32>,
    return
  }
  func.func @transform_0(%arg0: i32) -> (i32, i32) {
    %c0_i32 = arith.constant 0 : i32
    %c0_i32_0 = arith.constant 0 : i32
    return %arg0, %c0_i32 : i32, i32
  }
  func.func @transform_1(%arg0: i32) -> (i32, i32) {
    %c0_i32 = arith.constant 0 : i32
    %c0_i32_0 = arith.constant 0 : i32
    %c0_i32_1 = arith.constant 0 : i32
    return %c0_i32, %c0_i32_0 : i32, i32
  }
  func.func @transform_2(%arg0: i32) -> (i32, i32) {
    %c0_i32 = arith.constant 0 : i32
    %c0_i32_0 = arith.constant 0 : i32
    %c0_i32_1 = arith.constant 0 : i32
    return %c0_i32, %c0_i32_0 : i32, i32
  }
  func.func @transform_3(%arg0: i32) -> (i32, i32) {
    %c0_i32 = arith.constant 0 : i32
    %c0_i32_0 = arith.constant 0 : i32
    %c0_i32_1 = arith.constant 0 : i32
    return %c0_i32, %c0_i32_0 : i32, i32
  }
  func.func @transform_4(%arg0: i32) -> (i32, i32) {
    %c0_i32 = arith.constant 0 : i32
    %c0_i32_0 = arith.constant 0 : i32
    %c0_i32_1 = arith.constant 0 : i32
    return %c0_i32, %c0_i32_0 : i32, i32
  }
  func.func @transform_5(%arg0: i32) -> (i32, i32) {
    %c0_i32 = arith.constant 0 : i32
    %c0_i32_0 = arith.constant 0 : i32
    %c0_i32_1 = arith.constant 0 : i32
    return %c0_i32, %c0_i32_0 : i32, i32
  }
  func.func @transform_6(%arg0: i32) -> (i32, i32) {
    %c0_i32 = arith.constant 0 : i32
    %c0_i32_0 = arith.constant 0 : i32
    %c0_i32_1 = arith.constant 0 : i32
    return %c0_i32, %c0_i32_0 : i32, i32
  }
  func.func @transform_7(%arg0: i32) -> (i32, i32) {
    %c0_i32 = arith.constant 0 : i32
    %c0_i32_0 = arith.constant 0 : i32
    %c0_i32_1 = arith.constant 0 : i32
    return %c0_i32, %c0_i32_0 : i32, i32
  }
  func.func @transform_8(%arg0: i32) -> (i32, i32) {
    %c0_i32 = arith.constant 0 : i32
    %c0_i32_0 = arith.constant 0 : i32
    %c0_i32_1 = arith.constant 0 : i32
    return %c0_i32, %c0_i32_0 : i32, i32
  }
  func.func @transform_9(%arg0: i32) -> (i32, i32) {
    %c0_i32 = arith.constant 0 : i32
    %c0_i32_0 = arith.constant 0 : i32
    %c0_i32_1 = arith.constant 0 : i32
    return %c0_i32, %c0_i32_0 : i32, i32
  }
  func.func @transform_10(%arg0: i32) -> (i32, i32) {
    %c0_i32 = arith.constant 0 : i32
    %c0_i32_0 = arith.constant 0 : i32
    %c0_i32_1 = arith.constant 0 : i32
    return %c0_i32, %c0_i32_0 : i32, i32
  }
  func.func @transform_11(%arg0: i32) -> (i32, i32) {
    %c0_i32 = arith.constant 0 : i32
    %c0_i32_0 = arith.constant 0 : i32
    %c0_i32_1 = arith.constant 0 : i32
    return %c0_i32, %c0_i32_0 : i32, i32
  }
  func.func @transform_12(%arg0: i32) -> (i32, i32) {
    %c0_i32 = arith.constant 0 : i32
    %c0_i32_0 = arith.constant 0 : i32
    %c0_i32_1 = arith.constant 0 : i32
    return %c0_i32, %c0_i32_0 : i32, i32
  }
  func.func @transform_13(%arg0: i32) -> (i32, i32) {
    %c0_i32 = arith.constant 0 : i32
    %c0_i32_0 = arith.constant 0 : i32
    %c0_i32_1 = arith.constant 0 : i32
    return %c0_i32, %c0_i32_0 : i32, i32
  }
  func.func @transform_14(%arg0: i32) -> (i32, i32) {
    %c0_i32 = arith.constant 0 : i32
    %c0_i32_0 = arith.constant 0 : i32
    %c0_i32_1 = arith.constant 0 : i32
    return %c0_i32, %c0_i32_0 : i32, i32
  }
  func.func @transform_15(%arg0: i32) -> (i32, i32) {
    %c0_i32 = arith.constant 0 : i32
    %c0_i32_0 = arith.constant 0 : i32
    %c0_i32_1 = arith.constant 0 : i32
    return %c0_i32, %c0_i32_0 : i32, i32
  }
  func.func @transform_16(%arg0: i32) -> (i32, i32) {
    %c0_i32 = arith.constant 0 : i32
    %c0_i32_0 = arith.constant 0 : i32
    %c0_i32_1 = arith.constant 0 : i32
    return %c0_i32, %c0_i32_0 : i32, i32
  }
  func.func @transform_17(%arg0: i32) -> (i32, i32) {
    %c0_i32 = arith.constant 0 : i32
    %c0_i32_0 = arith.constant 0 : i32
    return %arg0, %c0_i32 : i32, i32
  }
}

</mosaic_0001>

<bundles_post_ra>
// kernel: tpu_custom_call.1
= control target key start
LH: loop header
LB: loop body
LE: loop exit
PB: predicated region body
PF: predicated region fallthrough
CT: control target
= control target key end

     0   :  { %s2176_s0 = inlined_call_operand.vmem [shape: f32[8,32], index: 0, kind: input, shape index: {}]   ;;  %s2177_s1 = inlined_call_operand.vmem [shape: bf16[32,128], index: 1, kind: input, shape index: {}]   ;;  %s2178_s2 = inlined_call_operand.vmem [shape: f32[1,128], index: 2, kind: input, shape index: {}]   ;;  %s2179_s3 = inlined_call_operand.vmem [shape: bf16[128,256], index: 3, kind: input, shape index: {}]   ;;  %s2180_s4 = inlined_call_operand.vmem [shape: f32[1,256], index: 4, kind: input, shape index: {}]   ;;  %s2181_s5 = inlined_call_operand.vmem [shape: bf16[256,64], index: 5, kind: input, shape index: {}]   ;;  %s2182_s6 = inlined_call_operand.vmem [shape: f32[1,64], index: 6, kind: input, shape index: {}]   ;;  %s2183_s7 = inlined_call_operand.vmem [shape: bf16[64,32], index: 7, kind: input, shape index: {}]   ;;  %s2184_s8 = inlined_call_operand.vmem [shape: f32[1,32], index: 8, kind: input, shape index: {}]   ;;  %s2185_s9 = inlined_call_operand.vmem [shape: bf16[32,320], index: 9, kind: input, shape index: {}]   ;;  %s2186_s10 = inlined_call_operand.vmem [shape: f32[1,320], index: 10, kind: input, shape index: {}]   ;;  %s2187_s11 = inlined_call_operand.vmem [shape: bf16[128,256], index: 11, kind: input, shape index: {}]   ;;  %s2188_s12 = inlined_call_operand.vmem [shape: f32[1,256], index: 12, kind: input, shape index: {}]   ;;  %s2189_s13 = inlined_call_operand.vmem [shape: bf16[128,128], index: 13, kind: input, shape index: {}]   ;;  %s2190_s14 = inlined_call_operand.vmem [shape: f32[1,128], index: 14, kind: input, shape index: {}]   ;;  %s2191_s15 = inlined_call_operand.vmem [shape: bf16[448,24], index: 15, kind: input, shape index: {}]   ;;  %s2192_s16 = inlined_call_operand.vmem [shape: f32[1,24], index: 16, kind: input, shape index: {}]   ;;  %s2193_s17 = inlined_call_operand.hbm [shape: f32[8,16], index: 17, kind: output, shape index: {}]  }
   0x1   :  { %2195 = sst [smem:[#allocation5_spill]] %s2176_s0 }
   0x2   :  { %2196 = sst [smem:[#allocation6_spill]] %s2177_s1 }
   0x3   :  { %s2197_s26 = sld [smem:[#allocation6_spill]]  ;;  %v1683_v1 = vmov 0.0   ;;  %vm1684_vm0 = vmmov 0   ;;  %v1545_v4 = vld [vmem:[%s2179_s3 + $0x74] ss:$8 sps:$4 sm:$0xff]   ;;  %vm83_vm1 = vcmask 261120  }
   0x4   :  { %1485 = vmatprep.subr.bf16.mxu1 %v1683_v1  ;;  %1489 = vmatprep.mubr.msk.bf16.mxu1 %vm1684_vm0, %v1683_v1  ;;  %s2198_s30 = sld [smem:[#allocation5_spill]]  ;;  %v1543_v6 = vld [vmem:[%s2179_s3 + $0x70] ss:$8 sps:$4 sm:$0xff]   ;;  %v1548_v7 = vld [vmem:[%s2179_s3 + $0x64] ss:$8 sps:$4 sm:$0xff]  }
   0x5   :  { %v1546_v8 = vld [vmem:[%s2179_s3 + $0x60] ss:$8 sps:$4 sm:$0xff]   ;;  %v1551_v9 = vld [vmem:[%s2179_s3 + $0x54] ss:$8 sps:$4 sm:$0xff]   ;;  %v1549_v10 = vld [vmem:[%s2179_s3 + $0x50] ss:$8 sps:$4 sm:$0xff]  }
   0x6   :  { %v1554_v11 = vld [vmem:[%s2179_s3 + $0x44] ss:$8 sps:$4 sm:$0xff]   ;;  %v1552_v12 = vld [vmem:[%s2179_s3 + $0x40] ss:$8 sps:$4 sm:$0xff]   ;;  %v1557_v13 = vld [vmem:[%s2179_s3 + $0x34] ss:$8 sps:$4 sm:$0xff]  }
   0x7   :  { %v1555_v14 = vld [vmem:[%s2179_s3 + $0x30] ss:$8 sps:$4 sm:$0xff]   ;;  %v1560_v15 = vld [vmem:[%s2179_s3 + $0x24] ss:$8 sps:$4 sm:$0xff]   ;;  %v1558_v16 = vld [vmem:[%s2179_s3 + $0x20] ss:$8 sps:$4 sm:$0xff]  }
   0x8   :  { %v1563_v17 = vld [vmem:[%s2179_s3 + $0x14] ss:$8 sps:$4 sm:$0xff]   ;;  %v1561_v18 = vld [vmem:[%s2179_s3 + $0x10] ss:$8 sps:$4 sm:$0xff]  }
   0x9   :  { %v1541_v0 = vld [vmem:[%s2197_s26 + $0x8] sm:$0xff]   ;;  %v1542_v2 = vld [vmem:[%s2197_s26] sm:$0xff]  }
   0xa   :  { %1486 = vmatpush3.bf16.msra.mxu1 %v1541_v0  ;;  %v1793_v3 = vld [vmem:[%s2198_s30] sm:$0xff] }
   0xb   :  { %1487 = vmatprep.subr.bf16.mxu1 %v1683_v1  ;;  %v59_v5 = vpack.c.bf16 %v1793_v3, %v1793_v3 }
   0xe   :  { %1488 = vmatpush3.bf16.msra.mxu1 %v1542_v2 }
   0xf   :  { %237 = vmatprep.subr.bf16.mxu1 %v1545_v4 }
  0x11   :  { %1490 = vmatmul.mubr.msk.bf16.vlgmr.msra.gmra.mxu1 %vm83_vm1, %v59_v5 }
  0x12   :  { %238 = vmatpush1.bf16.msra.mxu1 %v1543_v6 }
  0x13   :  { %239 = vmatprep.subr.bf16.mxu1 %v1548_v7 }
  0x16   :  { %240 = vmatpush1.bf16.msra.mxu1 %v1546_v8 }
  0x17   :  { %241 = vmatprep.subr.bf16.mxu1 %v1551_v9 }
  0x1a   :  { %242 = vmatpush1.bf16.msra.mxu1 %v1549_v10 }
  0x1b   :  { %243 = vmatprep.subr.bf16.mxu1 %v1554_v11 }
  0x1e   :  { %244 = vmatpush1.bf16.msra.mxu1 %v1552_v12 }
  0x1f   :  { %245 = vmatprep.subr.bf16.mxu1 %v1557_v13 }
  0x22   :  { %246 = vmatpush1.bf16.msra.mxu1 %v1555_v14 }
  0x23   :  { %247 = vmatprep.subr.bf16.mxu1 %v1560_v15 }
  0x26   :  { %248 = vmatpush1.bf16.msra.mxu1 %v1558_v16 }
  0x27   :  { %249 = vmatprep.subr.bf16.mxu1 %v1563_v17 }
  0x2a   :  { %250 = vmatpush1.bf16.msra.mxu1 %v1561_v18 }
  0x2b   :  { %22 = vsyncpa [#allocation3], 0  ;;  %v1566_v19 = vld [vmem:[%s2179_s3 + $0x4] ss:$8 sps:$4 sm:$0xff]   ;;  %v1564_v20 = vld [vmem:[%s2179_s3] ss:$8 sps:$4 sm:$0xff]   ;;  %v147_v47 = vlaneseq }
  0x2c   :  { %251 = vmatprep.subr.bf16.mxu1 %v1566_v19  ;;  %v1685_v21 = vmov 0   ;;  %v1567_v22 = vld [vmem:[%s2181_s5 + $0x78] sm:$0xff]   ;;  %v1569_v24 = vld [vmem:[%s2181_s5 + $0x70] sm:$0xff]   ;;  %v1571_v26 = vld [vmem:[%s2181_s5 + $0x68] sm:$0xff]   ;;  %vm498_vm2 = vcmask 523264   ;;  %vm1296_vm3 = vcmask 64512  }
  0x2d   :  { %269 = vmatprep.mubr.bf16.mxu1 %v1685_v21  ;;  %v1568_v23 = vld [vmem:[%s2181_s5 + $0x38] sm:$0xff]   ;;  %1424 = vmatprep.subr.bf16.mxu0 %v1567_v22  ;;  %v1570_v25 = vld [vmem:[%s2181_s5 + $0x30] sm:$0xff]   ;;  %v1572_v27 = vld [vmem:[%s2181_s5 + $0x28] sm:$0xff]   ;;  %v1906_v48 = vshrl.u32 %v147_v47, 7  ;;  %vm1298_vm4 = vcmask 130048  }
  0x2e   :  { %252 = vmatpush1.bf16.msra.mxu1 %v1564_v20  ;;  %1425 = vmatpush3.bf16.msra.mxu0 %v1568_v23  ;;  %v1573_v28 = vld [vmem:[%s2181_s5 + $0x60] sm:$0xff]   ;;  %v1575_v30 = vld [vmem:[%s2181_s5 + $0x58] sm:$0xff]   ;;  %v1577_v32 = vld [vmem:[%s2181_s5 + $0x50] sm:$0xff]  }
  0x2f   :  { %1493 = vmatprep.subr.bf16.mxu1 %v1683_v1  ;;  %1426 = vmatprep.subr.bf16.mxu0 %v1569_v24  ;;  %v1574_v29 = vld [vmem:[%s2181_s5 + $0x20] sm:$0xff]   ;;  %v1576_v31 = vld [vmem:[%s2181_s5 + $0x18] sm:$0xff]   ;;  %v1578_v33 = vld [vmem:[%s2181_s5 + $0x10] sm:$0xff]   ;;  %v1909_v49 = vsub.s32 0, %v1906_v48  ;;  %v1915_v51 = vsub.s32 1, %v1906_v48 }
  0x30   :  { %v1314_v34 = vld [vmem:[%s2178_s2] ss:$0 sm:$0xff]  ;;  %v1579_v42 = vld [vmem:[%s2181_s5 + $0x48] sm:$0xff]   ;;  %v1583_v46 = vld [vmem:[%s2183_s7 + $0x18] sm:$0xff]   ;;  %s1688_s2 = smov 8  }
  0x31   :  { %v1580_v43 = vld [vmem:[%s2181_s5 + $0x8] sm:$0xff]   ;;  %v1581_v44 = vld [vmem:[%s2181_s5 + $0x40] sm:$0xff]   ;;  %v1584_v0 = vld [vmem:[%s2183_s7 + $0x10] sm:$0xff]  }
  0x32   :  { %1427 = vmatpush3.bf16.msra.mxu0 %v1570_v25  ;;  %v1582_v45 = vld [vmem:[%s2181_s5] sm:$0xff]   ;;  %v1585_v2 = vld [vmem:[%s2183_s7 + $0x8] sm:$0xff]   ;;  %v1595_v18 = vld [vmem:[%s2187_s11 + $0x70] ss:$8 sps:$4 sm:$0xff]  }
  0x33   :  { %1428 = vmatprep.subr.bf16.mxu0 %v1571_v26  ;;  %v145_v50 = vld [vmem:[%s2180_s4] sm:$0x3]  ;;  %v1587_v5 = vld [vmem:[%s2185_s9 + $0x18] ss:$12 sps:$4 sm:$0xff]   ;;  %v1589_v6 = vld [vmem:[%s2185_s9 + $0x1c] ss:$12 sps:$4 sm:$0xff]  }
  0x34   :  { %v150_v52 = vrot.slane %v145_v50, %v1909_v49  ;;  %v154_v53 = vrot.slane %v145_v50, %v1915_v51  ;;  %v1586_v4 = vld [vmem:[%s2183_s7] sm:$0xff]   ;;  %v1597_v19 = vld [vmem:[%s2187_s11 + $0x74] ss:$8 sps:$4 sm:$0xff]   ;;  %v1603_v24 = vld [vmem:[%s2187_s11 + $0x50] ss:$8 sps:$4 sm:$0xff]   ;;  %s1690_s7 = smov [#allocation2]  }
  0x35   :  { %v1334_v8 = vld [vmem:[%s2182_s6] ss:$0 sm:$0xff]  ;;  %v1592_v16 = vld [vmem:[%s2185_s9 + $0x4] ss:$12 sps:$4 sm:$0xff]   ;;  %v1605_v23 = vld [vmem:[%s2187_s11 + $0x54] ss:$8 sps:$4 sm:$0xff]  }
  0x36   :  { %1429 = vmatpush3.bf16.msra.mxu0 %v1572_v27  ;;  %v1590_v17 = vld [vmem:[%s2185_s9] ss:$12 sps:$4 sm:$0xff]   ;;  %v1613_v27 = vld [vmem:[%s2187_s11 + $0x34] ss:$8 sps:$4 sm:$0xff]   ;;  %s1306_s18 = sshll.u32 %s1690_s7, 4  ;;  %s1307_s18 = int_to_ptr.vmem [resolvable:$true] %s1306_s18 }
  0x37   :  { %1430 = vmatprep.subr.bf16.mxu0 %v1573_v28  ;;  %v1601_v20 = vld [vmem:[%s2187_s11 + $0x64] ss:$8 sps:$4 sm:$0xff]   ;;  %v1599_v22 = vld [vmem:[%s2187_s11 + $0x60] ss:$8 sps:$4 sm:$0xff]   ;;  %v1611_v28 = vld [vmem:[%s2187_s11 + $0x30] ss:$8 sps:$4 sm:$0xff]   ;;  %p1666_p1 = scmp.lt.s32.totalorder %s1307_s18, %s1307_s18 }
  0x38   :  { %v1609_v25 = vld [vmem:[%s2187_s11 + $0x44] ss:$8 sps:$4 sm:$0xff]   ;;  %v1607_v26 = vld [vmem:[%s2187_s11 + $0x40] ss:$8 sps:$4 sm:$0xff]   ;;  %v1614_v47 = vld [vmem:[%s2189_s13 + $0x18] sm:$0xff]   ;;  %s1661_s19 = scalar_lea.vmem %s1307_s18, 128 }
  0x39   :  { %v1618_v50 = vld [vmem:[%s2189_s13 + $0x10] sm:$0xff]   ;;  %p1662_p0 = scmp.ne.s32.totalorder %s1307_s18, %s1661_s19  ;;  %p1667_p2 = scmp.lt.s32.totalorder %s1661_s19, %s1661_s19 }
  0x3a   :  { %1431 = vmatpush3.bf16.msra.mxu0 %v1574_v29  ;;  %v1617_v29 = vld [vmem:[%s2187_s11 + $0x24] ss:$8 sps:$4 sm:$0xff]  }
  0x3b   :  { %1432 = vmatprep.subr.bf16.mxu0 %v1575_v30  ;;  %v1615_v30 = vld [vmem:[%s2187_s11 + $0x20] ss:$8 sps:$4 sm:$0xff]   ;;  %p1668_p3 = por %p1667_p2, %p1666_p1 }
  0x3d   :  { %p1669_p4 = pnand %p1668_p3, %p1662_p0 }
  0x3e   :  { %1433 = vmatpush3.bf16.msra.mxu0 %v1576_v31  ;;  %v1621_v31 = vld [vmem:[%s2187_s11 + $0x14] ss:$8 sps:$4 sm:$0xff]  }
  0x3f   :  { %1434 = vmatprep.subr.bf16.mxu0 %v1577_v32  ;;  %v1619_v32 = vld [vmem:[%s2187_s11 + $0x10] ss:$8 sps:$4 sm:$0xff]  }
  0x42   :  { %1435 = vmatpush3.bf16.msra.mxu0 %v1578_v33  ;;  %v1351_v33 = vld [vmem:[%s2184_s8] ss:$0 sm:$0xff] }
  0x43   :  { %1436 = vmatprep.subr.bf16.mxu0 %v1579_v42  ;;  %v1594_v42 = vld [vmem:[%s2185_s9 + $0x8] ss:$12 sps:$4 sm:$0xff]  }
  0x46   :  { %1437 = vmatpush3.bf16.msra.mxu0 %v1580_v43  ;;  %v1598_v43 = vld [vmem:[%s2189_s13 + $0x38] sm:$0xff]  }
  0x47   :  { %1438 = vmatprep.subr.bf16.mxu0 %v1581_v44  ;;  %v1602_v44 = vld [vmem:[%s2189_s13 + $0x30] sm:$0xff]  }
  0x4a   :  { %1439 = vmatpush3.bf16.msra.mxu0 %v1582_v45  ;;  %v1606_v45 = vld [vmem:[%s2189_s13 + $0x28] sm:$0xff]  }
  0x4b   :  { %616 = vmatprep.subr.bf16.mxu0 %v1589_v6 }
  0xd1   :  { %v121_v35 = vpop.f32.mrf.mxu1 }
  0xd2   :  { %v122_v36 = vadd.f32 %v1314_v34, %v121_v35 }
  0xd3   :  { %v1491_v37 = vpop.f32.mrf.mxu1 }
  0xd4   :  { %v127_v38 = vmax.f32 %v122_v36, 0.0 }
  0xd5   :  { %v124_v39 = vpop.f32.mrf.mxu1 }
  0xd6   :  { %v128_v40 = vpack.c.bf16 %v127_v38, %v127_v38  ;;  %v1593_v39 = vld [vmem:[%s2185_s9 + $0x20] ss:$12 sps:$4 sm:$0xff]  }
  0xd7   :  { %v1492_v41 = vpop.f32.mrf.mxu1 }
  0xd8   :  { %270 = vmatmul.mubr.bf16.vlgmr.msra.gmra.mxu1 %v128_v40 }
  0xd9   :  { %1501 = vmatprep.mubr.msk.bf16.mxu1 %vm1684_vm0, %v1683_v1  ;;  %1494 = vmatpush3.bf16.msra.mxu1 %v1583_v46  ;;  %v1610_v46 = vld [vmem:[%s2189_s13 + $0x20] sm:$0xff]  }
  0xda   :  { %1495 = vmatprep.subr.bf16.mxu1 %v1683_v1 }
  0xdd   :  { %1496 = vmatpush3.bf16.msra.mxu1 %v1584_v0 }
  0xde   :  { %1497 = vmatprep.subr.bf16.mxu1 %v1683_v1 }
  0xe1   :  { %1498 = vmatpush3.bf16.msra.mxu1 %v1585_v2  ;;  %v1629_v2 = vld [vmem:[%s2191_s15 + $0x70] sm:$0xff]  }
  0xe2   :  { %1499 = vmatprep.subr.bf16.mxu1 %v1683_v1 }
  0xe5   :  { %1500 = vmatpush3.bf16.msra.mxu1 %v1586_v4 }
  0xe6   :  { %794 = vmatprep.subr.bf16.mxu1 %v1597_v19  ;;  %v1638_v19 = vld [vmem:[%s2191_s15 + $0x10] sm:$0xff]  }
 0x198   :  { %v271_v54 = vpop.f32.mrf.mxu1 }
 0x199   :  { %v272_v55 = vadd.f32 %v271_v54, %v150_v52  ;;  %v1622_v52 = vld [vmem:[%s2189_s13 + $0x8] sm:$0xff]  }
 0x19a   :  { %v273_v56 = vpop.f32.mrf.mxu1  ;;  %v1623_v54 = vld [vmem:[%s2187_s11] ss:$8 sps:$4 sm:$0xff]  }
 0x19b   :  { %v274_v57 = vadd.f32 %v273_v56, %v154_v53  ;;  %v278_v58 = vmax.f32 %v272_v55, 0.0  ;;  %v1625_v53 = vld [vmem:[%s2187_s11 + $0x4] ss:$8 sps:$4 sm:$0xff]   ;;  %v1627_v56 = vld [vmem:[%s2191_s15 + $0x78] sm:$0xff]  }
 0x19c   :  { %v275_v59 = vpop.f32.mrf.mxu1  ;;  %v1626_v55 = vld [vmem:[%s2189_s13] sm:$0xff]  }
 0x19d   :  { %v279_v60 = vmax.f32 %v274_v57, 0.0  ;;  %v280_v63 = vpack.c.bf16 %v278_v58, %v278_v58  ;;  %v2053_v57 = vld [vmem:[%s2186_s10] sm:$0x7] }
 0x19e   :  { %v276_v61 = vpop.f32.mrf.mxu1  ;;  %v561_v58 = vrot.slane %v2053_v57, %v1915_v51 }
 0x19f   :  { %v281_v62 = vpack.c.bf16 %v279_v60, %v279_v60 }
 0x1a1   :  { %449 = vmatprep.mubr.bf16.mxu0 %v281_v62  ;;  %v1628_v62 = vld [vmem:[%s2191_s15 + $0x38] sm:$0xff]  }
 0x1a2   :  { %450 = vmatmul.mubr.bf16.vlgmr.msra.gmra.mxu0 %v280_v63 }
 0x1a3   :  { %636 = vmatprep.mubr.bf16.mxu0 %v1685_v21  ;;  %617 = vmatpush1.bf16.msra.mxu0 %v1587_v5 }
 0x1a4   :  { %618 = vmatprep.subr.bf16.mxu0 %v1592_v16  ;;  %v1635_v16 = vld [vmem:[%s2191_s15 + $0x58] sm:$0xff]  }
 0x1a7   :  { %619 = vmatpush1.bf16.msra.mxu0 %v1590_v17  ;;  %v1636_v17 = vld [vmem:[%s2191_s15 + $0x18] sm:$0xff]  }
 0x1a8   :  { %1505 = vmatprep.subr.bf16.mxu0 %v1683_v1 }
 0x262   :  { %v1440_v7 = vpop.f32.mrf.mxu0 }
 0x264   :  { %v1441_v9 = vpop.f32.mrf.mxu0 }
 0x265   :  { %v1442_v10 = vadd.f32 %v1441_v9, %v1440_v7  ;;  %v1630_v7 = vld [vmem:[%s2191_s15 + $0x30] sm:$0xff]  }
 0x266   :  { %v1443_v11 = vpop.f32.mrf.mxu0 }
 0x267   :  { %v452_v12 = vadd.f32 %v1442_v10, %v1334_v8  ;;  %v1631_v8 = vld [vmem:[%s2191_s15 + $0x68] sm:$0xff]  }
 0x268   :  { %v1444_v13 = vpop.f32.mrf.mxu0  ;;  %v1632_v11 = vld [vmem:[%s2191_s15 + $0x28] sm:$0xff]  }
 0x269   :  { %v457_v14 = vmax.f32 %v452_v12, 0.0  ;;  %v1633_v12 = vld [vmem:[%s2191_s15 + $0x60] sm:$0xff]  }
 0x26b   :  { %v458_v15 = vpack.c.bf16 %v457_v14, %v457_v14 }
 0x26d   :  { %1502 = vmatmul.mubr.msk.bf16.vlgmr.msra.gmra.mxu1 %vm498_vm2, %v458_v15  ;;  %v1634_v15 = vld [vmem:[%s2191_s15 + $0x20] sm:$0xff]  }
 0x26e   :  { %826 = vmatprep.mubr.bf16.mxu1 %v1685_v21  ;;  %795 = vmatpush1.bf16.msra.mxu1 %v1595_v18  ;;  %v1637_v18 = vld [vmem:[%s2191_s15 + $0x50] sm:$0xff]  }
 0x26f   :  { %796 = vmatprep.subr.bf16.mxu1 %v1601_v20  ;;  %v1639_v20 = vld [vmem:[%s2191_s15 + $0x48] sm:$0xff]  }
 0x272   :  { %797 = vmatpush1.bf16.msra.mxu1 %v1599_v22  ;;  %v1640_v22 = vld [vmem:[%s2191_s15 + $0x8] sm:$0xff]  }
 0x273   :  { %798 = vmatprep.subr.bf16.mxu1 %v1605_v23  ;;  %v1641_v23 = vld [vmem:[%s2191_s15 + $0x40] sm:$0xff]  }
 0x276   :  { %799 = vmatpush1.bf16.msra.mxu1 %v1603_v24  ;;  %v1642_v24 = vld [vmem:[%s2191_s15] sm:$0xff]  }
 0x277   :  { %800 = vmatprep.subr.bf16.mxu1 %v1609_v25  ;;  %v1643_v25 = vld [vmem:[%s2191_s15 + $0xb8] sm:$0xff]  }
 0x27a   :  { %801 = vmatpush1.bf16.msra.mxu1 %v1607_v26  ;;  %v1644_v26 = vld [vmem:[%s2191_s15 + $0xb0] sm:$0xff]  }
 0x27b   :  { %802 = vmatprep.subr.bf16.mxu1 %v1613_v27  ;;  %v1645_v27 = vld [vmem:[%s2191_s15 + $0xa8] sm:$0xff]  }
 0x27e   :  { %803 = vmatpush1.bf16.msra.mxu1 %v1611_v28  ;;  %v1646_v28 = vld [vmem:[%s2191_s15 + $0xa0] sm:$0xff]  }
 0x27f   :  { %804 = vmatprep.subr.bf16.mxu1 %v1617_v29  ;;  %v1647_v29 = vld [vmem:[%s2191_s15 + $0x98] sm:$0xff]  }
 0x282   :  { %805 = vmatpush1.bf16.msra.mxu1 %v1615_v30  ;;  %v1648_v30 = vld [vmem:[%s2191_s15 + $0x90] sm:$0xff]  }
 0x283   :  { %806 = vmatprep.subr.bf16.mxu1 %v1621_v31  ;;  %v1649_v31 = vld [vmem:[%s2191_s15 + $0x88] sm:$0xff]  }
 0x286   :  { %807 = vmatpush1.bf16.msra.mxu1 %v1619_v32  ;;  %v1650_v32 = vld [vmem:[%s2191_s15 + $0x80] sm:$0xff]  }
 0x287   :  { %808 = vmatprep.subr.bf16.mxu1 %v1625_v53 }
 0x28a   :  { %809 = vmatpush1.bf16.msra.mxu1 %v1623_v54  ;;  %v564_v54 = vsub.s32 2, %v1906_v48  ;;  %v1390_v48 = vld [vmem:[%s2192_s16] ss:$0 sm:$0xff]  ;;  %s1689_s16 = smov 4  }
 0x28b   :  { %1463 = vmatprep.subr.bf16.mxu1 %v1627_v56 }
 0x32d   :  { %v536_v34 = vpop.f32.mrf.mxu1 }
 0x32e   :  { %v537_v35 = vadd.f32 %v1351_v33, %v536_v34  ;;  %v1651_v33 = vld [vmem:[%s2191_s15 + $0xd8] sm:$0xff]   ;;  %v1652_v34 = vld [vmem:[%s2191_s15 + $0xd0] sm:$0xff]  }
 0x32f   :  { %v1503_v36 = vpop.f32.mrf.mxu1 }
 0x330   :  { %v542_v37 = vadd.f32 %v537_v35, %v1793_v3  ;;  %v1653_v35 = vld [vmem:[%s2191_s15 + $0xc8] sm:$0xff]   ;;  %v1654_v36 = vld [vmem:[%s2191_s15 + $0xc0] sm:$0xff]   ;;  %s1686_s15 = smov 64  }
 0x331   :  { %v539_v38 = vpop.f32.mrf.mxu1 }
 0x332   :  { %v543_v40 = vpack.c.bf16 %v542_v37, %v542_v37  ;;  %v702_v37 = vld [vmem:[%s2188_s12] sm:$0x3]  ;;  %s1687_s12 = smov 116  }
 0x333   :  { %v1504_v41 = vpop.f32.mrf.mxu1  ;;  %v707_v38 = vrot.slane %v702_v37, %v1909_v49 }
 0x334   :  { %1363 = vmatmul.mubr.msk.bf16.vlgmr.msra.gmra.mxu0 %vm83_vm1, %v543_v40  ;;  %v1381_v41 = vld [vmem:[%s2190_s14] ss:$0 sm:$0xff] }
 0x335   :  { %1506 = vmatpush3.bf16.msra.mxu0 %v1593_v39  ;;  %1509 = vmatprep.mubr.msk.bf16.mxu0 %vm1684_vm0, %v1683_v1  ;;  %v711_v39 = vrot.slane %v702_v37, %v1915_v51 }
 0x336   :  { %1507 = vmatprep.subr.bf16.mxu0 %v1683_v1 }
 0x339   :  { %1508 = vmatpush3.bf16.msra.mxu0 %v1594_v42 }
 0x33a   :  { %1513 = vmatprep.subr.bf16.mxu0 %v1683_v1 }
 0x33c   :  { %1510 = vmatmul.mubr.msk.bf16.vlgmr.msra.gmra.mxu0 %vm83_vm1, %v543_v40 }
 0x33d   :  { %1514 = vmatpush3.bf16.msra.mxu0 %v1598_v43  ;;  %1529 = vmatprep.mubr.msk.bf16.mxu0 %vm1684_vm0, %v1683_v1 }
 0x33e   :  { %1515 = vmatprep.subr.bf16.mxu0 %v1683_v1 }
 0x341   :  { %1516 = vmatpush3.bf16.msra.mxu0 %v1602_v44 }
 0x342   :  { %1517 = vmatprep.subr.bf16.mxu0 %v1683_v1 }
 0x345   :  { %1518 = vmatpush3.bf16.msra.mxu0 %v1606_v45 }
 0x346   :  { %1519 = vmatprep.subr.bf16.mxu0 %v1683_v1 }
 0x349   :  { %1520 = vmatpush3.bf16.msra.mxu0 %v1610_v46 }
 0x34a   :  { %1521 = vmatprep.subr.bf16.mxu0 %v1683_v1 }
 0x34d   :  { %1522 = vmatpush3.bf16.msra.mxu0 %v1614_v47 }
 0x34e   :  { %1523 = vmatprep.subr.bf16.mxu0 %v1683_v1 }
 0x351   :  { %1524 = vmatpush3.bf16.msra.mxu0 %v1618_v50 }
 0x352   :  { %1525 = vmatprep.subr.bf16.mxu0 %v1683_v1 }
 0x355   :  { %1526 = vmatpush3.bf16.msra.mxu0 %v1622_v52 }
 0x356   :  { %1527 = vmatprep.subr.bf16.mxu0 %v1683_v1  ;;  %v557_v1 = vrot.slane %v2053_v57, %v1909_v49 }
 0x359   :  { %1528 = vmatpush3.bf16.msra.mxu0 %v1626_v55  ;;  %v565_v55 = vrot.slane %v2053_v57, %v564_v54 }
 0x35a   :  { %1230 = vmatprep.subr.bf16.mxu0 %v1685_v21 }
 0x3f4   :  { %v638_v59 = vpop.f32.mrf.mxu0 }
 0x3f5   :  { %v639_v60 = vadd.f32 %v638_v59, %v557_v1 }
 0x3f6   :  { %v640_v61 = vpop.f32.mrf.mxu0 }
 0x3f7   :  { %v685_v63 = vpack.c.bf16 %v639_v60, %v639_v60  ;;  %v641_v0 = vadd.f32 %v640_v61, %v561_v58 }
 0x3f8   :  { %v642_v4 = vpop.f32.mrf.mxu0 }
 0x3f9   :  { %v835_v5 = vpack.c.bf16 %v641_v0, %v641_v0  ;;  %827 = vmatmul.mubr.bf16.vlgmr.msra.gmra.mxu1 %v685_v63 }
 0x3fa   :  { %v643_v6 = vpop.f32.mrf.mxu0  ;;  %1464 = vmatpush3.bf16.msra.mxu1 %v1628_v62 }
 0x3fb   :  { %1530 = vmatmul.mubr.bf16.vlgmr.msra.gmra.mxu0 %v835_v5  ;;  %1465 = vmatprep.subr.bf16.mxu1 %v1629_v2 }
 0x3fc   :  { %v2071_v9 = vpop.f32.mrf.mxu0  ;;  %1231 = vmatpush1.bf16.msra.mxu0 %v1643_v25 }
 0x3fd   :  { %1232 = vmatprep.subr.bf16.mxu0 %v1685_v21  ;;  %v680_v56 = vadd.f32 %v2071_v9, %v565_v55 }
 0x3fe   :  { %v1511_v10 = vpop.f32.mrf.mxu0  ;;  %1466 = vmatpush3.bf16.msra.mxu1 %v1630_v7 }
 0x3ff   :  { %1467 = vmatprep.subr.bf16.mxu1 %v1631_v8 }
 0x400   :  { %v682_v13 = vpop.f32.mrf.mxu0  ;;  %1233 = vmatpush1.bf16.msra.mxu0 %v1644_v26 }
 0x401   :  { %1234 = vmatprep.subr.bf16.mxu0 %v1685_v21 }
 0x402   :  { %v1512_v14 = vpop.f32.mrf.mxu0  ;;  %1468 = vmatpush3.bf16.msra.mxu1 %v1632_v11 }
 0x403   :  { %1469 = vmatprep.subr.bf16.mxu1 %v1633_v12 }
 0x404   :  { %1235 = vmatpush1.bf16.msra.mxu0 %v1645_v27 }
 0x405   :  { %1236 = vmatprep.subr.bf16.mxu0 %v1685_v21 }
 0x406   :  { %1470 = vmatpush3.bf16.msra.mxu1 %v1634_v15 }
 0x407   :  { %1471 = vmatprep.subr.bf16.mxu1 %v1635_v16 }
 0x408   :  { %1237 = vmatpush1.bf16.msra.mxu0 %v1646_v28 }
 0x409   :  { %1238 = vmatprep.subr.bf16.mxu0 %v1685_v21 }
 0x40a   :  { %1472 = vmatpush3.bf16.msra.mxu1 %v1636_v17 }
 0x40b   :  { %1473 = vmatprep.subr.bf16.mxu1 %v1637_v18 }
 0x40c   :  { %1239 = vmatpush1.bf16.msra.mxu0 %v1647_v29 }
 0x40d   :  { %1240 = vmatprep.subr.bf16.mxu0 %v1685_v21 }
 0x40e   :  { %1474 = vmatpush3.bf16.msra.mxu1 %v1638_v19 }
 0x40f   :  { %1475 = vmatprep.subr.bf16.mxu1 %v1639_v20 }
 0x410   :  { %1241 = vmatpush1.bf16.msra.mxu0 %v1648_v30 }
 0x411   :  { %1242 = vmatprep.subr.bf16.mxu0 %v1685_v21 }
 0x412   :  { %1476 = vmatpush3.bf16.msra.mxu1 %v1640_v22 }
 0x413   :  { %1477 = vmatprep.subr.bf16.mxu1 %v1641_v23 }
 0x414   :  { %1243 = vmatpush1.bf16.msra.mxu0 %v1649_v31 }
 0x415   :  { %1244 = vmatprep.subr.bf16.mxu0 %v1685_v21 }
 0x416   :  { %1478 = vmatpush3.bf16.msra.mxu1 %v1642_v24 }
 0x418   :  { %1245 = vmatpush1.bf16.msra.mxu0 %v1650_v32 }
 0x419   :  { %1254 = vmatprep.subr.bf16.mxu0 %v1685_v21 }
 0x41c   :  { %1255 = vmatpush2.bf16.msra.mxu0 %v1651_v33 }
 0x41d   :  { %1256 = vmatprep.subr.bf16.mxu0 %v1685_v21 }
 0x420   :  { %1257 = vmatpush2.bf16.msra.mxu0 %v1652_v34 }
 0x421   :  { %1258 = vmatprep.subr.bf16.mxu0 %v1685_v21 }
 0x424   :  { %1259 = vmatpush2.bf16.msra.mxu0 %v1653_v35 }
 0x425   :  { %1260 = vmatprep.subr.bf16.mxu0 %v1685_v21 }
 0x428   :  { %1261 = vmatpush2.bf16.msra.mxu0 %v1654_v36 }
 0x4b9   :  { %v828_v40 = vpop.f32.mrf.mxu1 }
 0x4ba   :  { %v829_v42 = vadd.f32 %v828_v40, %v707_v38 }
 0x4bb   :  { %v830_v21 = vpop.f32.mrf.mxu1  ;;  %v941_v43 = vpop.f32.mrf.mxu0 }
 0x4bc   :  { %v831_v44 = vadd.f32 %v830_v21, %v711_v39  ;;  %v942_v45 = vadd.f32 %v1381_v41, %v941_v43  ;;  %v952_v52 = vpack.c.bf16 %v829_v42, %v829_v42 }
 0x4bd   :  { %v832_v46 = vpop.f32.mrf.mxu1  ;;  %v1531_v47 = vpop.f32.mrf.mxu0 }
 0x4be   :  { %v953_v50 = vpack.c.bf16 %v831_v44, %v831_v44  ;;  %948 = vrot.lane.b32.xlu0 %v942_v45, %s1686_s15 }
 0x4bf   :  { %v833_v53 = vpop.f32.mrf.mxu1  ;;  %v944_v49 = vpop.f32.mrf.mxu0 }
 0x4c0   :  { %1222 = vmatprep.mubr.bf16.mxu1 %v953_v50 }
 0x4c1   :  { %v1532_v51 = vpop.f32.mrf.mxu0  ;;  %1223 = vmatmul.mubr.bf16.vlgmr.msra.gmra.mxu1 %v952_v52 }
 0x4c2   :  { %1278 = vrot.lane.b32.xlu0 %v1793_v3, %s1687_s12 }
 0x530   :  { %v949_v1 = vpop.permute.xlu0 %948 }
 0x531   :  { %v951_v58 = vsel %vm498_vm2, %v680_v56, %v949_v1  ;;  %v955_v59 = vpack.c.bf16 %v949_v1, %v949_v1 }
 0x532   :  { %v954_v60 = vpack.c.bf16 %v951_v58, %v951_v58 }
 0x533   :  { %1419 = vmatprep.mubr.msk.bf16.mxu0 %vm498_vm2, %v955_v59 }
 0x534   :  { %1263 = vmatmul.mubr.bf16.vlgmr.msra.gmra.mxu0 %v954_v60  ;;  %v1279_v9 = vpop.permute.xlu0 %1278 }
 0x581   :  { %v1479_v61 = vpop.f32.mrf.mxu1 }
 0x583   :  { %v1480_v62 = vpop.f32.mrf.mxu1 }
 0x584   :  { %v1481_v63 = vadd.f32 %v1480_v62, %v1479_v61 }
 0x585   :  { %v1482_v0 = vpop.f32.mrf.mxu1 }
 0x586   :  { %v1225_v57 = vadd.f32 %v1481_v63, %v1390_v48 }
 0x587   :  { %v1483_v2 = vpop.f32.mrf.mxu1 }
 0x5f4   :  { %v1264_v4 = vpop.f32.mrf.mxu0 }
 0x5f5   :  { %v1265_v5 = vadd.f32 %v1264_v4, %v1225_v57 }
 0x5f6   :  { %v1266_v6 = vpop.f32.mrf.mxu0 }
 0x5f7   :  { %1655 = vtanh.f32 %v1265_v5  ;;  %v1420_v12 = vmul.f32 -1.442695, %v1265_v5 }
 0x5f8   :  { %v1267_v7 = vpop.f32.mrf.mxu0 }
 0x5f9   :  { %1657 = vpow2.f32 %v1420_v12 }
 0x5fa   :  { %v1268_v8 = vpop.f32.mrf.mxu0 }
 0x604   :  { %v1656_v10 = vpop.eup %1655 }
 0x605   :  { %v1281_v11 = vsub.f32 %v1656_v10, %v1279_v9 }
 0x606   :  { %v1658_v13 = vpop.eup %1657 }
 0x607   :  { %1283 = vrot.lane.b32.xlu1 %v1281_v11, %s1688_s2  ;;  %v1274_v14 = vadd.f32 1.0, %v1658_v13 }
 0x609   :  { %1659 = vrcp.f32 %v1274_v14 }
 0x616   :  { %v1660_v15 = vpop.eup %1659 }
 0x679   :  { %v1284_v16 = vpop.permute.xlu1 %1283 }
 0x67a   :  { %v1286_v17 = vmul.f32 %v1660_v15, %v1284_v16 }
 0x67c   :  { %1288 = vrot.lane.b32.xlu1 %v1286_v17, %s1689_s16 }
 0x6ee   :  { %v1289_v18 = vpop.permute.xlu1 %1288 }
 0x6ef   :  { %v1291_v19 = vadd.f32 %v1289_v18, %v1793_v3 }
 0x6f1   :  { %1293 = vrot.lane.b32.xlu0 %v1291_v19, %s1687_s12 }
 0x763   :  { %v1294_v20 = vpop.permute.xlu0 %1293 }
 0x764   :  { %v1297_v22 = vsel %vm1296_vm3, %v1265_v5, %v1294_v20 }
 0x765   :  { %1299 = vst.msk [vmem:[#allocation2] sm:$0xff] %vm1298_vm4, %v1297_v22 }
 0x766   :  { %1672 = shalt.err (!%p1669_p4)
}
 0x767   :  { %1309 = dma.vmem_to_hbm [thread:$0]  %s1307_s18, 128, %s2193_s17, [#allocation3]  }
 0x768   :  { %1681 = dma.done.wait [#allocation3], 128  }
 0x769   :  { %1682 = vsyncadd [#allocation3], 4294967168 }
 0x76a   :  { %1313 = vsyncpa [#allocation3], 1 }

</bundles_post_ra>
